<compile_context>
chip_gen: v6e
topology: v6e:2x2x1
jax: 0.10.0
libtpu: 0.0.40
codegen_flags: <defaults>
</compile_context>

<pallas_src>
import jax
import jax.numpy as jnp
from jax.experimental import pallas as pl
from jax.experimental.pallas import tpu as pltpu

LANE = 128  # vreg lane width (all generations)


def _round_up(n, m):
    return ((n + m - 1) // m) * m


def _sublane_pack(dtype):
    # rows per sublane granule: 8 for 4-byte dtypes, 16 for bf16, 32 for int8.
    return 8 * max(1, 4 // jnp.dtype(dtype).itemsize)


def _padded_tile_bytes(rows, cols, dtype):
    # VMEM footprint of a (rows, cols) tile after (sublane, lane) padding.
    return (_round_up(rows, _sublane_pack(dtype)) * _round_up(cols, LANE)
            * jnp.dtype(dtype).itemsize)


def _cost_estimate(batch, in_size, hidden, out_size, x_dtype):
    flops = 2 * batch * (in_size * hidden + hidden * out_size)
    transcendentals = batch * hidden  # tanh
    bytes_accessed = (batch * in_size * jnp.dtype(x_dtype).itemsize  # x stream
                      + batch * out_size * 4                         # f32 out stream
                      + (in_size * hidden + hidden * out_size
                         + hidden + out_size) * 4)                   # resident params
    return pl.CostEstimate(flops=flops, transcendentals=transcendentals,
                           bytes_accessed=bytes_accessed)


# --------------------------------------------------------------------------
# Kernel bodies (fully fused in VMEM: 2 MXU matmuls, f32 bias adds, EUP tanh)
# --------------------------------------------------------------------------
def _mlp_kernel_t(x_ref, w1_ref, b1_ref, w2_ref, b2_ref, o_ref):
    """Feature-major: x [in, blk] -> o [out, blk]; batch on the 128-lane axis."""
    x = x_ref[...]
    h = jnp.dot(w1_ref[...], x, preferred_element_type=jnp.float32)
    h = jnp.tanh(h + b1_ref[...])            # bias + tanh kept in f32 (v5e EUP)
    h = h.astype(w2_ref.dtype)               # bf16 MXU path only if weights are bf16
    y = jnp.dot(w2_ref[...], h, preferred_element_type=jnp.float32) + b2_ref[...]
    o_ref[...] = y.astype(o_ref.dtype)


def _mlp_kernel_b(x_ref, w1t_ref, b1_ref, w2t_ref, b2_ref, o_ref):
    """Batch-major (torch layout): x [blk, in] -> o [blk, out]."""
    x = x_ref[...]
    h = jnp.dot(x, w1t_ref[...], preferred_element_type=jnp.float32)
    h = jnp.tanh(h + b1_ref[...])
    h = h.astype(w2t_ref.dtype)
    y = jnp.dot(h, w2t_ref[...], preferred_element_type=jnp.float32) + b2_ref[...]
    o_ref[...] = y.astype(o_ref.dtype)


# --------------------------------------------------------------------------
# Feature-major fast path
# --------------------------------------------------------------------------
def embedding_network_forward_t(x_t, w1, b1, w2, b2, *, block_batch=None,
                                vmem_limit_bytes=None):
    """x_t: [input_size, B] (feature-major).  Returns y_t: [output_size, B] f32.

    w1=[hidden,in], b1=[hidden], w2=[out,hidden], b2=[out]  (torch layouts).
    """
    in_size, B = x_t.shape
    hidden = w1.shape[0]
    out_size = w2.shape[0]
    assert w1.shape == (hidden, in_size) and w2.shape == (out_size, hidden)

    b1c = b1.astype(jnp.float32).reshape(hidden, 1)
    b2c = b2.astype(jnp.float32).reshape(out_size, 1)

    if block_batch is None:
        # Few, large steps, but >=2 steps when the batch allows it (v7x megacore).
        target = max(LANE, _round_up(pl.cdiv(B, 2), LANE))
        block_batch = min(32768, target)
    block_batch = max(LANE, _round_up(block_batch, LANE))

    B_pad = _round_up(B, block_batch)
    if B_pad != B:
        # Padded columns produce garbage outputs; they are sliced off below.
        x_t = jnp.pad(x_t, ((0, 0), (0, B_pad - B)))

    grid = (B_pad // block_batch,)

    if vmem_limit_bytes is None:
        stream = 2 * (_padded_tile_bytes(in_size, block_batch, x_t.dtype)
                      + _padded_tile_bytes(out_size, block_batch, jnp.float32))
        resident = (_padded_tile_bytes(hidden, in_size, w1.dtype)
                    + _padded_tile_bytes(out_size, hidden, w2.dtype)
                    + _padded_tile_bytes(hidden, 1, jnp.float32)
                    + _padded_tile_bytes(out_size, 1, jnp.float32))
        vmem_limit_bytes = max(16 << 20, stream + resident + (8 << 20))

    out = pl.pallas_call(
        _mlp_kernel_t,
        out_shape=jax.ShapeDtypeStruct((out_size, B_pad), jnp.float32),
        grid_spec=pltpu.PrefetchScalarGridSpec(
            num_scalar_prefetch=0,
            grid=grid,
            in_specs=[
                # Streamed, lane-dense x tile: [in_size, block_batch].
                pl.BlockSpec((in_size, block_batch), lambda i: (0, i)),
                # Weights / biases: constant block index -> resident in VMEM.
                pl.BlockSpec((hidden, in_size), lambda i: (0, 0)),
                pl.BlockSpec((hidden, 1), lambda i: (0, 0)),
                pl.BlockSpec((out_size, hidden), lambda i: (0, 0)),
                pl.BlockSpec((out_size, 1), lambda i: (0, 0)),
            ],
            # Lane-dense output slab: last dim is a multiple of 128 -> unmasked vst.
            out_specs=pl.BlockSpec((out_size, block_batch), lambda i: (0, i)),
        ),
        compiler_params=pltpu.CompilerParams(
            dimension_semantics=("parallel",),
            vmem_limit_bytes=vmem_limit_bytes,
        ),
        cost_estimate=_cost_estimate(B_pad, in_size, hidden, out_size, x_t.dtype),
    )(x_t, w1, b1c, w2, b2c)

    if B_pad != B:
        out = out[:, :B]
    return out


# --------------------------------------------------------------------------
# Torch-layout path ([..., input_size] -> [..., output_size])
# --------------------------------------------------------------------------
def embedding_network_forward(x, w1, b1, w2, b2, *, block_batch=None,
                              vmem_limit_bytes=None):
    """Matches EmbeddingNetwork.forward semantics for batch-major callers."""
    squeeze = (x.ndim == 1)
    if squeeze:
        x = x[None, :]
    lead = x.shape[:-1]
    in_size = x.shape[-1]
    x2 = x.reshape(-1, in_size)               # free row-major reshape, no copy
    B = x2.shape[0]
    hidden = w1.shape[0]
    out_size = w2.shape[0]

    # Tiny (KiB-scale) one-time parameter re-layout; x itself is pass-through
    # (no wrapper-side transpose or dtype cast of the activation stream).
    w1t = jnp.transpose(w1)                   # [in, hidden]
    w2t = jnp.transpose(w2)                   # [hidden, out]
    b1r = b1.astype(jnp.float32).reshape(1, hidden)
    b2r = b2.astype(jnp.float32).reshape(1, out_size)

    pack = _sublane_pack(x2.dtype)
    if block_batch is None:
        target = max(pack, _round_up(pl.cdiv(B, 2), pack))   # >=2 steps (megacore)
        block_batch = min(8192, target)
    block_batch = max(pack, _round_up(block_batch, pack))

    B_pad = _round_up(B, block_batch)
    if B_pad != B:
        x2 = jnp.pad(x2, ((0, B_pad - B), (0, 0)))

    grid = (B_pad // block_batch,)

    if vmem_limit_bytes is None:
        stream = 2 * (_padded_tile_bytes(block_batch, in_size, x2.dtype)
                      + _padded_tile_bytes(block_batch, out_size, jnp.float32))
        vmem_limit_bytes = max(16 << 20, stream + (8 << 20))

    out = pl.pallas_call(
        _mlp_kernel_b,
        out_shape=jax.ShapeDtypeStruct((B_pad, out_size), jnp.float32),
        grid_spec=pltpu.PrefetchScalarGridSpec(
            num_scalar_prefetch=0,
            grid=grid,
            in_specs=[
                pl.BlockSpec((block_batch, in_size), lambda i: (i, 0)),
                pl.BlockSpec((in_size, hidden), lambda i: (0, 0)),
                pl.BlockSpec((1, hidden), lambda i: (0, 0)),
                pl.BlockSpec((hidden, out_size), lambda i: (0, 0)),
                pl.BlockSpec((1, out_size), lambda i: (0, 0)),
            ],
            out_specs=pl.BlockSpec((block_batch, out_size), lambda i: (i, 0)),
        ),
        compiler_params=pltpu.CompilerParams(
            dimension_semantics=("parallel",),
            vmem_limit_bytes=vmem_limit_bytes,
        ),
        cost_estimate=_cost_estimate(B_pad, in_size, hidden, out_size, x2.dtype),
    )(x2, w1t, b1r, w2t, b2r)

    if B_pad != B:
        out = out[:B]
    out = out.reshape(*lead, out_size)
    if squeeze:
        out = out[0]
    return out


def init_params(key, input_size, hidden_size, output_size):
    """nn.Linear-style U(-1/sqrt(fan_in), 1/sqrt(fan_in)) init, torch layouts."""
    k1, k2, k3, k4 = jax.random.split(key, 4)
    bound1 = 1.0 / (input_size ** 0.5)
    bound2 = 1.0 / (hidden_size ** 0.5)
    w1 = jax.random.uniform(k1, (hidden_size, input_size), jnp.float32, -bound1, bound1)
    b1 = jax.random.uniform(k2, (hidden_size,), jnp.float32, -bound1, bound1)
    w2 = jax.random.uniform(k3, (output_size, hidden_size), jnp.float32, -bound2, bound2)
    b2 = jax.random.uniform(k4, (output_size,), jnp.float32, -bound2, bound2)
    return w1, b1, w2, b2


if __name__ == "__main__":
    batch, input_size, hidden_size, output_size = 128, 16, 32, 8

    key = jax.random.PRNGKey(0)
    kx, kp = jax.random.split(key)
    x = jax.random.normal(kx, (batch, input_size), jnp.float32)
    w1, b1, w2, b2 = init_params(kp, input_size, hidden_size, output_size)

    # Reference (same math as the PyTorch forward).
    y_ref = jnp.tanh(x @ w1.T + b1) @ w2.T + b2

    # 1) Feature-major fast path (caller stores activations as [in, B]).
    x_t = jnp.asarray(x.T)
    y_t = jax.block_until_ready(embedding_network_forward_t(x_t, w1, b1, w2, b2))
    assert y_t.shape == (output_size, batch)
    assert jnp.allclose(y_t.T, y_ref, atol=1e-5, rtol=1e-5)

    # 1b) Ragged feature-major batch (padded to the 128-lane granule).
    y_t_r = jax.block_until_ready(
        embedding_network_forward_t(x_t[:, :100], w1, b1, w2, b2))
    assert y_t_r.shape == (output_size, 100)
    assert jnp.allclose(y_t_r.T, y_ref[:100], atol=1e-5, rtol=1e-5)

    # 2) Torch-layout path: full batch, ragged batch, and 1-D input.
    y_b = jax.block_until_ready(embedding_network_forward(x, w1, b1, w2, b2))
    assert y_b.shape == (batch, output_size)
    assert jnp.allclose(y_b, y_ref, atol=1e-5, rtol=1e-5)

    y_b_r = jax.block_until_ready(embedding_network_forward(x[:100], w1, b1, w2, b2))
    assert y_b_r.shape == (100, output_size)
    assert jnp.allclose(y_b_r, y_ref[:100], atol=1e-5, rtol=1e-5)

    y_vec = jax.block_until_ready(embedding_network_forward(x[0], w1, b1, w2, b2))
    assert y_vec.shape == (output_size,)
    assert jnp.allclose(y_vec, y_ref[0], atol=1e-5, rtol=1e-5)

    # 3) bf16 pass-through (caller already stores x / weights in bf16; no
    #    wrapper-side casts).  f32 accumulation, bias add and tanh stay f32.
    y_bf = jax.block_until_ready(embedding_network_forward_t(
        x_t.astype(jnp.bfloat16), w1.astype(jnp.bfloat16), b1,
        w2.astype(jnp.bfloat16), b2))
    assert jnp.allclose(y_bf.T, y_ref, atol=1e-1, rtol=1e-1)

    print("KERNEL_OK")
</pallas_src>

<mosaic_0001>
module attributes {stable_mosaic.version = 11 : i64} {
  func.func @_mlp_kernel_t(%arg0: i32, %arg1: memref<16x128xf32, #tpu.memory_space<vmem>>, %arg2: memref<32x16xf32, #tpu.memory_space<vmem>>, %arg3: memref<32x1xf32, #tpu.memory_space<vmem>>, %arg4: memref<8x32xf32, #tpu.memory_space<vmem>>, %arg5: memref<8x1xf32, #tpu.memory_space<vmem>>, %arg6: memref<8x128xf32, #tpu.memory_space<vmem>>) attributes {dimension_semantics = [#tpu.dimension_semantics<parallel>], iteration_bounds = array<i64: 1>, scalar_prefetch = 0 : i64, scratch_operands = 0 : i64, tpu.core_type = #tpu.core_type<tc>, window_params = [{transform_indices = @transform_0, window_bounds = array<i64: 16, 128>}, {pipeline_mode = #tpu.pipeline_mode<synchronous>, transform_indices = @transform_1, window_bounds = array<i64: 32, 16>}, {pipeline_mode = #tpu.pipeline_mode<synchronous>, transform_indices = @transform_2, window_bounds = array<i64: 32, 1>}, {pipeline_mode = #tpu.pipeline_mode<synchronous>, transform_indices = @transform_3, window_bounds = array<i64: 8, 32>}, {pipeline_mode = #tpu.pipeline_mode<synchronous>, transform_indices = @transform_4, window_bounds = array<i64: 8, 1>}, {transform_indices = @transform_5, window_bounds = array<i64: 8, 128>}]} {
    %c0 = arith.constant 0 : index
    %c0_0 = arith.constant 0 : index
    %0 = vector.load %arg1[%c0, %c0_0] : memref<16x128xf32, #tpu.memory_space<vmem>>, vector<16x128xf32>
    %c0_1 = arith.constant 0 : index
    %c0_2 = arith.constant 0 : index
    %1 = vector.load %arg2[%c0_1, %c0_2] : memref<32x16xf32, #tpu.memory_space<vmem>>, vector<32x16xf32>
    %cst = arith.constant dense<0.000000e+00> : vector<32x128xf32>
    %2 = tpu.matmul %1, %0, %cst {dimension_numbers = #tpu.dot_dimension_numbers<[1], [0], [0], [1], [0, 0, 1, 1], [], []>} : vector<32x16xf32>, vector<16x128xf32>, vector<32x128xf32> -> vector<32x128xf32>
    %c0_3 = arith.constant 0 : index
    %c0_4 = arith.constant 0 : index
    %3 = vector.load %arg3[%c0_3, %c0_4] : memref<32x1xf32, #tpu.memory_space<vmem>>, vector<32x1xf32>
    %4 = vector.broadcast %3 : vector<32x1xf32> to vector<32x128xf32>
    %5 = arith.addf %2, %4 : vector<32x128xf32>
    %6 = math.tanh %5 : vector<32x128xf32>
    %c0_5 = arith.constant 0 : index
    %c0_6 = arith.constant 0 : index
    %7 = vector.load %arg4[%c0_5, %c0_6] : memref<8x32xf32, #tpu.memory_space<vmem>>, vector<8x32xf32>
    %cst_7 = arith.constant dense<0.000000e+00> : vector<8x128xf32>
    %8 = tpu.matmul %7, %6, %cst_7 {dimension_numbers = #tpu.dot_dimension_numbers<[1], [0], [0], [1], [0, 0, 1, 1], [], []>} : vector<8x32xf32>, vector<32x128xf32>, vector<8x128xf32> -> vector<8x128xf32>
    %c0_8 = arith.constant 0 : index
    %c0_9 = arith.constant 0 : index
    %9 = vector.load %arg5[%c0_8, %c0_9] : memref<8x1xf32, #tpu.memory_space<vmem>>, vector<8x1xf32>
    %10 = vector.broadcast %9 : vector<8x1xf32> to vector<8x128xf32>
    %11 = arith.addf %8, %10 : vector<8x128xf32>
    %c0_10 = arith.constant 0 : index
    %c0_11 = arith.constant 0 : index
    %12 = vector.load %arg6[%c0_10, %c0_11] : memref<8x128xf32, #tpu.memory_space<vmem>>, vector<8x128xf32>
    tpu.vector_store %arg6[%c0_10, %c0_11], %11 {strides = array<i32>} : memref<8x128xf32, #tpu.memory_space<vmem>>, vector<8x128xf32>,
    return
  }
  func.func @transform_0(%arg0: i32) -> (i32, i32) {
    %c0_i32 = arith.constant 0 : i32
    %c0_i32_0 = arith.constant 0 : i32
    return %c0_i32, %arg0 : i32, i32
  }
  func.func @transform_1(%arg0: i32) -> (i32, i32) {
    %c0_i32 = arith.constant 0 : i32
    %c0_i32_0 = arith.constant 0 : i32
    %c0_i32_1 = arith.constant 0 : i32
    return %c0_i32, %c0_i32_0 : i32, i32
  }
  func.func @transform_2(%arg0: i32) -> (i32, i32) {
    %c0_i32 = arith.constant 0 : i32
    %c0_i32_0 = arith.constant 0 : i32
    %c0_i32_1 = arith.constant 0 : i32
    return %c0_i32, %c0_i32_0 : i32, i32
  }
  func.func @transform_3(%arg0: i32) -> (i32, i32) {
    %c0_i32 = arith.constant 0 : i32
    %c0_i32_0 = arith.constant 0 : i32
    %c0_i32_1 = arith.constant 0 : i32
    return %c0_i32, %c0_i32_0 : i32, i32
  }
  func.func @transform_4(%arg0: i32) -> (i32, i32) {
    %c0_i32 = arith.constant 0 : i32
    %c0_i32_0 = arith.constant 0 : i32
    %c0_i32_1 = arith.constant 0 : i32
    return %c0_i32, %c0_i32_0 : i32, i32
  }
  func.func @transform_5(%arg0: i32) -> (i32, i32) {
    %c0_i32 = arith.constant 0 : i32
    %c0_i32_0 = arith.constant 0 : i32
    return %c0_i32, %arg0 : i32, i32
  }
}

</mosaic_0001>

<bundles_post_ra>
// kernel: tpu_custom_call.1
= control target key start
LH: loop header
LB: loop body
LE: loop exit
PB: predicated region body
PF: predicated region fallthrough
CT: control target
= control target key end

     0   :  { %vm51_vm0 = vcmask 130048   ;;  %v322_v4 = vmov 0   ;;  %s399_s0 = inlined_call_operand.vmem [shape: f32[16,128], index: 0, kind: input, shape index: {}]   ;;  %s400_s1 = inlined_call_operand.vmem [shape: f32[32,16], index: 1, kind: input, shape index: {}]   ;;  %s401_s2 = inlined_call_operand.vmem [shape: f32[32,1], index: 2, kind: input, shape index: {}]   ;;  %s402_s3 = inlined_call_operand.vmem [shape: f32[8,32], index: 3, kind: input, shape index: {}]   ;;  %s403_s4 = inlined_call_operand.vmem [shape: f32[8,1], index: 4, kind: input, shape index: {}]   ;;  %s404_s5 = inlined_call_operand.hbm [shape: f32[8,128], index: 5, kind: output, shape index: {}]  }
   0x1   :  { %v22_v0 = vld [vmem:[%s399_s0 + $0x8] sm:$0xff]  ;;  %v21_v1 = vld [vmem:[%s399_s0] sm:$0xff]  ;;  %290 = vset.pattern.permute.xlu0 %v322_v4  ;;  %v30_v5 = vld [vmem:[%s401_s2 + $0x18] sm:$0xff] }
   0x2   :  { %v23_v2 = vld [vmem:[%s400_s1] sm:$0xff]  ;;  %265 = vmatprep.subr.mxu0 %v22_v0  ;;  %v24_v3 = vld [vmem:[%s400_s1 + $0x8] sm:$0xff]  ;;  %v25_v7 = vld [vmem:[%s400_s1 + $0x10] sm:$0xff]  ;;  %48 = vperm.xlu0 %290, %v30_v5  }
   0x3   :  { %269 = vmatprep.mubr.msk.f32.mxu0 %vm51_vm0, %v23_v2  ;;  %266 = vmatpush3.msra.mxu0 %v22_v0  ;;  %v28_v6 = vld [vmem:[%s401_s2 + $0x8] sm:$0xff] }
   0x4   :  { %267 = vmatprep.subr.mxu0 %v21_v1 }
   0x5   :  { %10 = vsyncpa [#allocation3], 0  ;;  %268 = vmatpush3.msra.mxu0 %v21_v1  ;;  %291 = vset.pattern.permute.xlu1 %v322_v4  ;;  %v29_v8 = vld [vmem:[%s401_s2 + $0x10] sm:$0xff]  ;;  %v26_v9 = vld [vmem:[%s400_s1 + $0x18] sm:$0xff]  ;;  %v323_v12 = vmov 0.0   ;;  %vm324_vm1 = vmmov 0  }
   0x6   :  { %270 = vmatmul.mubr.msk.f32.vlgmr.msra.gmra.mxu0 %vm51_vm0, %v24_v3  ;;  %38 = vperm.xlu1 %291, %v28_v6   ;;  %v27_v10 = vld [vmem:[%s401_s2] sm:$0xff]  ;;  %vm160_vm2 = vcmask 261120  }
   0x7   :  { %272 = vmatprep.mubr.msk.f32.mxu0 %vm51_vm0, %v25_v7  ;;  %43 = vperm.xlu0 %290, %v29_v8   ;;  %v154_v11 = vld [vmem:[%s403_s4] sm:$0xff]  ;;  %s325_s4 = smov [#allocation2]  }
   0x8   :  { %275 = vmatprep.subr.mxu1 %v323_v12  ;;  %283 = vmatprep.mubr.msk.f32.mxu1 %vm324_vm1, %v323_v12  ;;  %v153_v28 = vld [vmem:[%s402_s3] sm:$0xff]  ;;  %s241_s14 = sshll.u32 %s325_s4, 4  ;;  %s242_s14 = int_to_ptr.vmem [resolvable:$true] %s241_s14 }
   0x9   :  { %s300_s15 = scalar_lea.vmem %s242_s14, 128  ;;  %p305_p1 = scmp.lt.s32.totalorder %s242_s14, %s242_s14 }
   0xa   :  { %273 = vmatmul.mubr.msk.f32.gmra.mxu0 %vm51_vm0, %v26_v9  ;;  %33 = vperm.xlu1 %291, %v27_v10   ;;  %p301_p0 = scmp.ne.s32.totalorder %s242_s14, %s300_s15  ;;  %p306_p2 = scmp.lt.s32.totalorder %s300_s15, %s300_s15 }
   0xb   :  { %157 = vperm.xlu0 %290, %v154_v11  }
   0xc   :  { %p307_p3 = por %p306_p2, %p305_p1 }
   0xe   :  { %p308_p4 = pnand %p307_p3, %p301_p0 }
  0x7d   :  { %v49_v13 = vpop.permute.xlu0 %48 }
  0x81   :  { %v39_v14 = vpop.permute.xlu1 %38 }
  0x82   :  { %v44_v18 = vpop.permute.xlu0 %43 }
  0x85   :  { %v34_v20 = vpop.permute.xlu1 %33 }
  0x86   :  { %v158_v30 = vpop.permute.xlu0 %157 }
  0xc6   :  { %v271_v15 = vpop.f32.mrf.mxu0 }
  0xc7   :  { %v136_v22 = vadd.f32 %v271_v15, %v39_v14 }
  0xc8   :  { %v130_v16 = vpop.f32.mrf.mxu0 }
  0xc9   :  { %v131_v24 = vadd.f32 %v130_v16, %v34_v20 }
  0xca   :  { %v274_v17 = vpop.f32.mrf.mxu0 }
  0xcb   :  { %v146_v19 = vadd.f32 %v274_v17, %v49_v13 }
  0xcc   :  { %v140_v21 = vpop.f32.mrf.mxu0 }
  0xcd   :  { %292 = vtanh.f32 %v146_v19  ;;  %v141_v23 = vadd.f32 %v140_v21, %v44_v18 }
  0xcf   :  { %294 = vtanh.f32 %v141_v23 }
  0xd0   :  { %296 = vtanh.f32 %v136_v22 }
  0xd1   :  { %298 = vtanh.f32 %v131_v24 }
  0xda   :  { %v293_v25 = vpop.eup %292 }
  0xdb   :  { %276 = vmatpush3.msra.mxu1 %v293_v25 }
  0xdc   :  { %v295_v26 = vpop.eup %294  ;;  %277 = vmatprep.subr.mxu1 %v323_v12 }
  0xdd   :  { %278 = vmatpush3.msra.mxu1 %v295_v26  ;;  %v297_v27 = vpop.eup %296 }
  0xde   :  { %279 = vmatprep.subr.mxu1 %v323_v12  ;;  %v299_v29 = vpop.eup %298 }
  0xdf   :  { %280 = vmatpush3.msra.mxu1 %v297_v27 }
  0xe0   :  { %281 = vmatprep.subr.mxu1 %v323_v12 }
  0xe1   :  { %282 = vmatpush3.msra.mxu1 %v299_v29 }
  0xe2   :  { %284 = vmatmul.mubr.msk.f32.vlgmr.msra.gmra.mxu1 %vm160_vm2, %v153_v28 }
 0x1a2   :  { %v230_v31 = vpop.f32.mrf.mxu1 }
 0x1a3   :  { %v231_v32 = vadd.f32 %v230_v31, %v158_v30 }
 0x1a4   :  { %v285_v33 = vpop.f32.mrf.mxu1 }
 0x1a5   :  { %234 = vst [vmem:[#allocation2] sm:$0xff] %v231_v32 }
 0x1a6   :  { %311 = shalt.err (!%p308_p4)
}
 0x1a7   :  { %244 = dma.vmem_to_hbm [thread:$0]  %s242_s14, 128, %s404_s5, [#allocation3]  }
 0x1a8   :  { %320 = dma.done.wait [#allocation3], 128  }
 0x1a9   :  { %321 = vsyncadd [#allocation3], 4294967168 }
 0x1aa   :  { %248 = vsyncpa [#allocation3], 1 }

</bundles_post_ra>
